<compile_context>
chip_gen: v6e
topology: v6e:2x2x1
jax: 0.10.0
libtpu: 0.0.40
codegen_flags: <defaults>
</compile_context>

<pallas_src>
import functools
import math

import jax
import jax.numpy as jnp
import numpy as np
from jax import lax
from jax.experimental import pallas as pl
from jax.experimental.pallas import tpu as pltpu


def _round_up(x: int, m: int) -> int:
    return -(-x // m) * m


# ----------------------------------------------------------------------------
# Pallas kernel: one block of TB (batch*channel) rows per grid step.
# ----------------------------------------------------------------------------
def _bezier2d_kernel(cp_ref, basis_ref, out_ref, bxy_ref, *,
                     n_frames, f_pad, eps, chunk):
    # cp_ref:    (TB, K2_pad)      rows = batch*channel, cols = [x coeffs | y coeffs | 0]
    # basis_ref: (2*F_pad, K2_pad) block-diagonal masked Bernstein basis (transposed)
    # out_ref:   (F_pad, TB)       lane-dense output block (frames x rows)
    # bxy_ref:   (2*F_pad, TB)     VMEM scratch for the matmul result

    # One small MXU matmul evaluates both coordinates of the masked piecewise Bezier
    # for every row of the block (segments already summed, mask folded into basis).
    bxy_ref[...] = lax.dot_general(
        basis_ref[...], cp_ref[...],
        dimension_numbers=(((1,), (1,)), ((), ())),
        preferred_element_type=jnp.float32)                        # (2*F_pad, TB)

    n_chunks = out_ref.shape[1] // chunk
    scale = 0.5 * float(n_frames - 1)

    def chunk_body(c, carry):
        off = pl.multiple_of(c * chunk, chunk)
        bx = bxy_ref[pl.ds(0, f_pad), pl.ds(off, chunk)]           # (F_pad, chunk) bezier_x
        # grid_x = (bezier_x*2 - 1)*(1 - eps); H == 1 so grid_y is inert.
        gx = (bx * 2.0 - 1.0) * (1.0 - eps)
        # Un-normalize (align_corners=True) + border padding (clamp).
        ix = jnp.clip((gx + 1.0) * scale, 0.0, float(n_frames - 1))

        # F.grid_sample(bilinear, border, align_corners=True) along W as a tent
        # weighting: sampled[f, b] = sum_k by[k, b] * relu(1 - |ix[f, b] - k|).
        # Unrolled over the small static number of source frames; per-k bezier_y rows
        # are re-loaded from VMEM scratch (vld slot) instead of held live in vregs.
        # TODO(synk): switch to the 2-tap floor/frac gather form once n_frames >~ 64
        # (the unrolled tent is O(F^2) VALU work).
        sampled = jnp.zeros_like(ix)
        for k in range(n_frames):
            w = jnp.maximum(0.0, 1.0 - jnp.abs(ix - float(k)))
            by_k = bxy_ref[pl.ds(f_pad + k, 1), pl.ds(off, chunk)]  # (1, chunk)
            sampled = sampled + w * by_k                            # sublane broadcast
        out_ref[:, pl.ds(off, chunk)] = sampled
        return carry

    lax.fori_loop(0, n_chunks, chunk_body, 0)


# ----------------------------------------------------------------------------
# Plain-JAX glue: constant buffers (support / mask / basis), packing, reshapes.
# ----------------------------------------------------------------------------
def _make_support_and_mask(n_frames, n_segments):
    modes = jnp.linspace(0.0, 1.0, n_segments + 1)[1:-1].reshape(1, -1)
    support = jnp.linspace(0.0, 1.0, n_frames).reshape(1, 1, -1)
    support = jnp.tile(support, (1, n_segments, 1))
    seg_starts = jnp.pad(modes, ((0, 0), (1, 0)))[..., None]      # (1, S, 1)
    seg_ends = jnp.roll(seg_starts, shift=-1, axis=1)
    seg_ends = seg_ends.at[:, -1, :].set(1.0)
    seg_ranges = seg_ends - seg_starts
    mask = (support >= seg_starts) & (support < seg_ends)
    mask = mask.at[:, -1, -1].set(True)
    support = (support - seg_starts) / seg_ranges
    support = support * mask
    return support[0].astype(jnp.float32), mask[0].astype(jnp.float32)


def _make_basis_matrix(n_frames, n_segments, degree):
    """Masked Bernstein basis A[(s, d), f] = mask[s,f]*C(deg,d)*t^d*(1-t)^(deg-d)."""
    support, mask = _make_support_and_mask(n_frames, n_segments)   # (S, F) each
    binc = jnp.array([math.comb(degree, i) for i in range(degree + 1)],
                     jnp.float32)[None, :, None]                   # (1, D1, 1)
    d = jnp.arange(degree + 1, dtype=jnp.float32)[None, :, None]   # (1, D1, 1)
    t = support[:, None, :]                                        # (S, 1, F)
    basis = binc * t ** d * (1.0 - t) ** (degree - d)              # (S, D1, F)
    basis = basis * mask[:, None, :]
    return basis.reshape(n_segments * (degree + 1), n_frames)      # (K, F)


def _pick_block(B: int):
    """Choose (TB, B_pad, chunk).

    TB is a power-of-two multiple of 128 (so the 512-lane inner chunk divides it),
    capped at 2048 (per-step VMEM footprint stays well under 1 MiB).  When there is
    enough work we keep >= 2 grid steps so a 2-TensorCore chip (v7x) can shard the
    "parallel" axis; B_pad is always a multiple of 128 -> lane-dense output stores.
    """
    b128 = _round_up(B, 128)
    target = b128 if b128 <= 128 else -(-b128 // 2)
    tb = 128
    while tb < target and tb < 2048:
        tb *= 2
    b_pad = _round_up(B, tb)
    chunk = min(tb, 512)   # divides tb by construction; bounds vreg pressure
    return tb, b_pad, chunk


def piecewise_bezier_2d_forward(cp, *, n_frames, n_segments, degree,
                                is_c1_cont=False, eps=1e-3):
    """cp: (bs, n_ch, n_seg, degree+1, 2) or (bs, n_seg, degree+1, 2) -> (.., n_frames)."""
    n_dim = cp.ndim
    if n_dim == 5:
        bs, n_ch = cp.shape[0], cp.shape[1]
        cp = cp.reshape(bs * n_ch, *cp.shape[2:])
    else:
        assert n_dim == 4
        bs, n_ch = cp.shape[0], 1
    B = cp.shape[0]
    D1 = degree + 1
    assert cp.shape == (B, n_segments, D1, 2)
    cp = cp.astype(jnp.float32)

    if is_c1_cont:  # C1-continuity fixup (same as the torch indexing assign)
        q1 = 2.0 * cp[:, :-1, -1, :] - cp[:, :-1, -2, :]
        cp = cp.at[:, 1:, 1, :].set(q1)

    # ---- constant masked Bernstein basis, folded once (block-diagonal, transposed).
    # Frame axis padded to a multiple of 8 so the bx/by split lands on a sublane tile.
    K = n_segments * D1
    K2 = 2 * K
    K2_pad = _round_up(K2, 8)
    F_pad = _round_up(n_frames, 8)
    A = _make_basis_matrix(n_frames, n_segments, degree)            # (K, F)
    basis_t = jnp.zeros((2 * F_pad, K2_pad), jnp.float32)
    basis_t = basis_t.at[:n_frames, :K].set(A.T)
    basis_t = basis_t.at[F_pad:F_pad + n_frames, K:K2].set(A.T)

    # ---- pack cp_x / cp_y into one (B, 2K) array; NO wrapper-side transpose — the
    # kernel contracts over the last axis directly so the result is already (2F, TB).
    cp_x = cp[..., 0].reshape(B, K)
    cp_y = cp[..., 1].reshape(B, K)
    cp_packed = jnp.concatenate([cp_x, cp_y], axis=1)               # (B, 2K)

    TB, B_pad, chunk = _pick_block(B)
    cp_packed = jnp.pad(cp_packed, ((0, B_pad - B), (0, K2_pad - K2)))

    kernel = functools.partial(_bezier2d_kernel, n_frames=n_frames, f_pad=F_pad,
                               eps=eps, chunk=chunk)
    out_t = pl.pallas_call(
        kernel,
        out_shape=jax.ShapeDtypeStruct((F_pad, B_pad), jnp.float32),
        grid=(B_pad // TB,),
        in_specs=[
            pl.BlockSpec((TB, K2_pad), lambda i: (i, 0)),            # per-block cp rows
            pl.BlockSpec((2 * F_pad, K2_pad), lambda i: (0, 0)),     # constant basis
        ],
        out_specs=pl.BlockSpec((F_pad, TB), lambda i: (0, i)),
        scratch_shapes=[pltpu.VMEM((2 * F_pad, TB), jnp.float32)],
        compiler_params=pltpu.CompilerParams(dimension_semantics=("parallel",)),
    )(cp_packed, basis_t)

    # Transpose back is cheap layout plumbing; a downstream consumer that accepts
    # (F, B) layout can skip it entirely (relevant mainly on v5e HBM bandwidth).
    out = out_t[:n_frames, :B].T                                     # (B, F)
    if n_dim == 5:
        out = out.reshape(bs, n_ch, n_frames)
    return out


# ----------------------------------------------------------------------------
# Pure-JAX reference (mirrors the PyTorch math) for a sanity check.
# ----------------------------------------------------------------------------
def _ref_forward(cp, *, n_frames, n_segments, degree, is_c1_cont=False, eps=1e-3):
    cp = cp.astype(jnp.float32)
    if is_c1_cont:
        q1 = 2.0 * cp[:, :-1, -1, :] - cp[:, :-1, -2, :]
        cp = cp.at[:, 1:, 1, :].set(q1)
    support, mask = _make_support_and_mask(n_frames, n_segments)
    t = support[None, :, :, None]                                  # (1, S, F, 1)
    d = jnp.arange(degree + 1, dtype=jnp.float32)
    binc = jnp.array([math.comb(degree, i) for i in range(degree + 1)], jnp.float32)
    basis = binc * t ** d * (1.0 - t) ** (degree - d)              # (1, S, F, D1)
    bez = jnp.sum(cp[:, :, None, :, :] * basis[..., None], axis=-2)  # (B, S, F, 2)
    bez = bez * mask[None, :, :, None]
    bez = jnp.sum(bez, axis=1)                                     # (B, F, 2)
    bx, by = bez[..., 0], bez[..., 1]
    gx = (bx * 2.0 - 1.0) * (1.0 - eps)
    ix = jnp.clip((gx + 1.0) * 0.5 * (n_frames - 1), 0.0, n_frames - 1.0)
    k = jnp.arange(n_frames, dtype=jnp.float32)
    w = jnp.maximum(0.0, 1.0 - jnp.abs(ix[..., None] - k))         # (B, F, F_in)
    return jnp.sum(w * by[:, None, :], axis=-1)                    # (B, F)


if __name__ == "__main__":
    bs, n_ch = 2, 4
    n_frames, n_segments, degree = 16, 3, 3
    eps = 1e-3

    key = jax.random.PRNGKey(0)
    logits = jax.random.normal(key, (bs, n_ch, n_segments, degree + 1, 2),
                               dtype=jnp.float32)
    # Deterministic control points in (0, 1) so the sampling grid stays in [-1, 1].
    cp = jnp.tanh(logits) * (1.0 - eps) * 0.5 + 0.5

    ok = True
    for c1 in (False, True):   # exercise both the plain path and the C1 fixup path
        out = piecewise_bezier_2d_forward(cp, n_frames=n_frames,
                                          n_segments=n_segments, degree=degree,
                                          is_c1_cont=c1, eps=eps)
        out = jax.block_until_ready(out)
        assert out.shape == (bs, n_ch, n_frames)

        ref = _ref_forward(cp.reshape(bs * n_ch, n_segments, degree + 1, 2),
                           n_frames=n_frames, n_segments=n_segments,
                           degree=degree, is_c1_cont=c1,
                           eps=eps).reshape(bs, n_ch, n_frames)
        np.testing.assert_allclose(np.asarray(out), np.asarray(ref),
                                   rtol=1e-4, atol=1e-4)
    if ok:
        print("KERNEL_OK")
</pallas_src>

<mosaic_0001>
module attributes {stable_mosaic.version = 11 : i64} {
  func.func @_bezier2d_kernel(%arg0: i32, %arg1: memref<128x24xf32, #tpu.memory_space<vmem>>, %arg2: memref<32x24xf32, #tpu.memory_space<vmem>>, %arg3: memref<16x128xf32, #tpu.memory_space<vmem>>, %arg4: memref<32x128xf32, #tpu.memory_space<vmem>>) attributes {dimension_semantics = [#tpu.dimension_semantics<parallel>], iteration_bounds = array<i64: 1>, scalar_prefetch = 0 : i64, scratch_operands = 1 : i64, tpu.core_type = #tpu.core_type<tc>, window_params = [{transform_indices = @transform_0, window_bounds = array<i64: 128, 24>}, {pipeline_mode = #tpu.pipeline_mode<synchronous>, transform_indices = @transform_1, window_bounds = array<i64: 32, 24>}, {transform_indices = @transform_2, window_bounds = array<i64: 16, 128>}]} {
    %c0 = arith.constant 0 : index
    %c0_0 = arith.constant 0 : index
    %0 = vector.load %arg2[%c0, %c0_0] : memref<32x24xf32, #tpu.memory_space<vmem>>, vector<32x24xf32>
    %c0_1 = arith.constant 0 : index
    %c0_2 = arith.constant 0 : index
    %1 = vector.load %arg1[%c0_1, %c0_2] : memref<128x24xf32, #tpu.memory_space<vmem>>, vector<128x24xf32>
    %cst = arith.constant dense<0.000000e+00> : vector<32x128xf32>
    %2 = tpu.matmul %0, %1, %cst {dimension_numbers = #tpu.dot_dimension_numbers<[1], [1], [0], [0], [0, 0, 1, 0], [], []>} : vector<32x24xf32>, vector<128x24xf32>, vector<32x128xf32> -> vector<32x128xf32>
    %c0_3 = arith.constant 0 : index
    %c0_4 = arith.constant 0 : index
    %3 = vector.load %arg4[%c0_3, %c0_4] : memref<32x128xf32, #tpu.memory_space<vmem>>, vector<32x128xf32>
    tpu.vector_store %arg4[%c0_3, %c0_4], %2 {strides = array<i32>} : memref<32x128xf32, #tpu.memory_space<vmem>>, vector<32x128xf32>,
    %c0_i32 = arith.constant 0 : i32
    %c128_i32 = arith.constant 128 : i32
    %4 = arith.muli %c0_i32, %c128_i32 : i32
    %5 = tpu.assume_multiple %4, 128 : i32
    %c0_5 = arith.constant 0 : index
    %6 = arith.index_cast %5 : i32 to index
    %7 = vector.load %arg4[%c0_5, %6] : memref<32x128xf32, #tpu.memory_space<vmem>>, vector<16x128xf32>
    %cst_6 = arith.constant 2.000000e+00 : f32
    %8 = vector.broadcast %cst_6 : f32 to vector<16x128xf32>
    %9 = arith.mulf %7, %8 : vector<16x128xf32>
    %cst_7 = arith.constant 1.000000e+00 : f32
    %10 = vector.broadcast %cst_7 : f32 to vector<16x128xf32>
    %11 = arith.subf %9, %10 : vector<16x128xf32>
    %cst_8 = arith.constant 9.990000e-01 : f32
    %12 = vector.broadcast %cst_8 : f32 to vector<16x128xf32>
    %13 = arith.mulf %11, %12 : vector<16x128xf32>
    %cst_9 = arith.constant 1.000000e+00 : f32
    %14 = vector.broadcast %cst_9 : f32 to vector<16x128xf32>
    %15 = arith.addf %13, %14 : vector<16x128xf32>
    %cst_10 = arith.constant 7.500000e+00 : f32
    %16 = vector.broadcast %cst_10 : f32 to vector<16x128xf32>
    %17 = arith.mulf %15, %16 : vector<16x128xf32>
    %cst_11 = arith.constant 0.000000e+00 : f32
    %cst_12 = arith.constant 1.500000e+01 : f32
    %18 = vector.broadcast %cst_11 : f32 to vector<16x128xf32>
    %19 = arith.maximumf %18, %17 : vector<16x128xf32>
    %20 = vector.broadcast %cst_12 : f32 to vector<16x128xf32>
    %21 = arith.minimumf %20, %19 : vector<16x128xf32>
    %cst_13 = arith.constant 0.000000e+00 : f32
    %22 = vector.broadcast %cst_13 : f32 to vector<16x128xf32>
    %cst_14 = arith.constant 0.000000e+00 : f32
    %23 = vector.broadcast %cst_14 : f32 to vector<16x128xf32>
    %24 = arith.subf %21, %23 : vector<16x128xf32>
    %25 = math.absf %24 : vector<16x128xf32>
    %cst_15 = arith.constant 1.000000e+00 : f32
    %26 = vector.broadcast %cst_15 : f32 to vector<16x128xf32>
    %27 = arith.subf %26, %25 : vector<16x128xf32>
    %cst_16 = arith.constant 0.000000e+00 : f32
    %28 = vector.broadcast %cst_16 : f32 to vector<16x128xf32>
    %29 = arith.maximumf %28, %27 : vector<16x128xf32>
    %c16 = arith.constant 16 : index
    %30 = arith.index_cast %5 : i32 to index
    %31 = vector.load %arg4[%c16, %30] : memref<32x128xf32, #tpu.memory_space<vmem>>, vector<1x128xf32>
    %32 = vector.broadcast %31 : vector<1x128xf32> to vector<16x128xf32>
    %33 = arith.mulf %29, %32 : vector<16x128xf32>
    %34 = arith.addf %22, %33 : vector<16x128xf32>
    %cst_17 = arith.constant 1.000000e+00 : f32
    %35 = vector.broadcast %cst_17 : f32 to vector<16x128xf32>
    %36 = arith.subf %21, %35 : vector<16x128xf32>
    %37 = math.absf %36 : vector<16x128xf32>
    %cst_18 = arith.constant 1.000000e+00 : f32
    %38 = vector.broadcast %cst_18 : f32 to vector<16x128xf32>
    %39 = arith.subf %38, %37 : vector<16x128xf32>
    %cst_19 = arith.constant 0.000000e+00 : f32
    %40 = vector.broadcast %cst_19 : f32 to vector<16x128xf32>
    %41 = arith.maximumf %40, %39 : vector<16x128xf32>
    %c17 = arith.constant 17 : index
    %42 = arith.index_cast %5 : i32 to index
    %43 = vector.load %arg4[%c17, %42] : memref<32x128xf32, #tpu.memory_space<vmem>>, vector<1x128xf32>
    %44 = vector.broadcast %43 : vector<1x128xf32> to vector<16x128xf32>
    %45 = arith.mulf %41, %44 : vector<16x128xf32>
    %46 = arith.addf %34, %45 : vector<16x128xf32>
    %cst_20 = arith.constant 2.000000e+00 : f32
    %47 = vector.broadcast %cst_20 : f32 to vector<16x128xf32>
    %48 = arith.subf %21, %47 : vector<16x128xf32>
    %49 = math.absf %48 : vector<16x128xf32>
    %cst_21 = arith.constant 1.000000e+00 : f32
    %50 = vector.broadcast %cst_21 : f32 to vector<16x128xf32>
    %51 = arith.subf %50, %49 : vector<16x128xf32>
    %cst_22 = arith.constant 0.000000e+00 : f32
    %52 = vector.broadcast %cst_22 : f32 to vector<16x128xf32>
    %53 = arith.maximumf %52, %51 : vector<16x128xf32>
    %c18 = arith.constant 18 : index
    %54 = arith.index_cast %5 : i32 to index
    %55 = vector.load %arg4[%c18, %54] : memref<32x128xf32, #tpu.memory_space<vmem>>, vector<1x128xf32>
    %56 = vector.broadcast %55 : vector<1x128xf32> to vector<16x128xf32>
    %57 = arith.mulf %53, %56 : vector<16x128xf32>
    %58 = arith.addf %46, %57 : vector<16x128xf32>
    %cst_23 = arith.constant 3.000000e+00 : f32
    %59 = vector.broadcast %cst_23 : f32 to vector<16x128xf32>
    %60 = arith.subf %21, %59 : vector<16x128xf32>
    %61 = math.absf %60 : vector<16x128xf32>
    %cst_24 = arith.constant 1.000000e+00 : f32
    %62 = vector.broadcast %cst_24 : f32 to vector<16x128xf32>
    %63 = arith.subf %62, %61 : vector<16x128xf32>
    %cst_25 = arith.constant 0.000000e+00 : f32
    %64 = vector.broadcast %cst_25 : f32 to vector<16x128xf32>
    %65 = arith.maximumf %64, %63 : vector<16x128xf32>
    %c19 = arith.constant 19 : index
    %66 = arith.index_cast %5 : i32 to index
    %67 = vector.load %arg4[%c19, %66] : memref<32x128xf32, #tpu.memory_space<vmem>>, vector<1x128xf32>
    %68 = vector.broadcast %67 : vector<1x128xf32> to vector<16x128xf32>
    %69 = arith.mulf %65, %68 : vector<16x128xf32>
    %70 = arith.addf %58, %69 : vector<16x128xf32>
    %cst_26 = arith.constant 4.000000e+00 : f32
    %71 = vector.broadcast %cst_26 : f32 to vector<16x128xf32>
    %72 = arith.subf %21, %71 : vector<16x128xf32>
    %73 = math.absf %72 : vector<16x128xf32>
    %cst_27 = arith.constant 1.000000e+00 : f32
    %74 = vector.broadcast %cst_27 : f32 to vector<16x128xf32>
    %75 = arith.subf %74, %73 : vector<16x128xf32>
    %cst_28 = arith.constant 0.000000e+00 : f32
    %76 = vector.broadcast %cst_28 : f32 to vector<16x128xf32>
    %77 = arith.maximumf %76, %75 : vector<16x128xf32>
    %c20 = arith.constant 20 : index
    %78 = arith.index_cast %5 : i32 to index
    %79 = vector.load %arg4[%c20, %78] : memref<32x128xf32, #tpu.memory_space<vmem>>, vector<1x128xf32>
    %80 = vector.broadcast %79 : vector<1x128xf32> to vector<16x128xf32>
    %81 = arith.mulf %77, %80 : vector<16x128xf32>
    %82 = arith.addf %70, %81 : vector<16x128xf32>
    %cst_29 = arith.constant 5.000000e+00 : f32
    %83 = vector.broadcast %cst_29 : f32 to vector<16x128xf32>
    %84 = arith.subf %21, %83 : vector<16x128xf32>
    %85 = math.absf %84 : vector<16x128xf32>
    %cst_30 = arith.constant 1.000000e+00 : f32
    %86 = vector.broadcast %cst_30 : f32 to vector<16x128xf32>
    %87 = arith.subf %86, %85 : vector<16x128xf32>
    %cst_31 = arith.constant 0.000000e+00 : f32
    %88 = vector.broadcast %cst_31 : f32 to vector<16x128xf32>
    %89 = arith.maximumf %88, %87 : vector<16x128xf32>
    %c21 = arith.constant 21 : index
    %90 = arith.index_cast %5 : i32 to index
    %91 = vector.load %arg4[%c21, %90] : memref<32x128xf32, #tpu.memory_space<vmem>>, vector<1x128xf32>
    %92 = vector.broadcast %91 : vector<1x128xf32> to vector<16x128xf32>
    %93 = arith.mulf %89, %92 : vector<16x128xf32>
    %94 = arith.addf %82, %93 : vector<16x128xf32>
    %cst_32 = arith.constant 6.000000e+00 : f32
    %95 = vector.broadcast %cst_32 : f32 to vector<16x128xf32>
    %96 = arith.subf %21, %95 : vector<16x128xf32>
    %97 = math.absf %96 : vector<16x128xf32>
    %cst_33 = arith.constant 1.000000e+00 : f32
    %98 = vector.broadcast %cst_33 : f32 to vector<16x128xf32>
    %99 = arith.subf %98, %97 : vector<16x128xf32>
    %cst_34 = arith.constant 0.000000e+00 : f32
    %100 = vector.broadcast %cst_34 : f32 to vector<16x128xf32>
    %101 = arith.maximumf %100, %99 : vector<16x128xf32>
    %c22 = arith.constant 22 : index
    %102 = arith.index_cast %5 : i32 to index
    %103 = vector.load %arg4[%c22, %102] : memref<32x128xf32, #tpu.memory_space<vmem>>, vector<1x128xf32>
    %104 = vector.broadcast %103 : vector<1x128xf32> to vector<16x128xf32>
    %105 = arith.mulf %101, %104 : vector<16x128xf32>
    %106 = arith.addf %94, %105 : vector<16x128xf32>
    %cst_35 = arith.constant 7.000000e+00 : f32
    %107 = vector.broadcast %cst_35 : f32 to vector<16x128xf32>
    %108 = arith.subf %21, %107 : vector<16x128xf32>
    %109 = math.absf %108 : vector<16x128xf32>
    %cst_36 = arith.constant 1.000000e+00 : f32
    %110 = vector.broadcast %cst_36 : f32 to vector<16x128xf32>
    %111 = arith.subf %110, %109 : vector<16x128xf32>
    %cst_37 = arith.constant 0.000000e+00 : f32
    %112 = vector.broadcast %cst_37 : f32 to vector<16x128xf32>
    %113 = arith.maximumf %112, %111 : vector<16x128xf32>
    %c23 = arith.constant 23 : index
    %114 = arith.index_cast %5 : i32 to index
    %115 = vector.load %arg4[%c23, %114] : memref<32x128xf32, #tpu.memory_space<vmem>>, vector<1x128xf32>
    %116 = vector.broadcast %115 : vector<1x128xf32> to vector<16x128xf32>
    %117 = arith.mulf %113, %116 : vector<16x128xf32>
    %118 = arith.addf %106, %117 : vector<16x128xf32>
    %cst_38 = arith.constant 8.000000e+00 : f32
    %119 = vector.broadcast %cst_38 : f32 to vector<16x128xf32>
    %120 = arith.subf %21, %119 : vector<16x128xf32>
    %121 = math.absf %120 : vector<16x128xf32>
    %cst_39 = arith.constant 1.000000e+00 : f32
    %122 = vector.broadcast %cst_39 : f32 to vector<16x128xf32>
    %123 = arith.subf %122, %121 : vector<16x128xf32>
    %cst_40 = arith.constant 0.000000e+00 : f32
    %124 = vector.broadcast %cst_40 : f32 to vector<16x128xf32>
    %125 = arith.maximumf %124, %123 : vector<16x128xf32>
    %c24 = arith.constant 24 : index
    %126 = arith.index_cast %5 : i32 to index
    %127 = vector.load %arg4[%c24, %126] : memref<32x128xf32, #tpu.memory_space<vmem>>, vector<1x128xf32>
    %128 = vector.broadcast %127 : vector<1x128xf32> to vector<16x128xf32>
    %129 = arith.mulf %125, %128 : vector<16x128xf32>
    %130 = arith.addf %118, %129 : vector<16x128xf32>
    %cst_41 = arith.constant 9.000000e+00 : f32
    %131 = vector.broadcast %cst_41 : f32 to vector<16x128xf32>
    %132 = arith.subf %21, %131 : vector<16x128xf32>
    %133 = math.absf %132 : vector<16x128xf32>
    %cst_42 = arith.constant 1.000000e+00 : f32
    %134 = vector.broadcast %cst_42 : f32 to vector<16x128xf32>
    %135 = arith.subf %134, %133 : vector<16x128xf32>
    %cst_43 = arith.constant 0.000000e+00 : f32
    %136 = vector.broadcast %cst_43 : f32 to vector<16x128xf32>
    %137 = arith.maximumf %136, %135 : vector<16x128xf32>
    %c25 = arith.constant 25 : index
    %138 = arith.index_cast %5 : i32 to index
    %139 = vector.load %arg4[%c25, %138] : memref<32x128xf32, #tpu.memory_space<vmem>>, vector<1x128xf32>
    %140 = vector.broadcast %139 : vector<1x128xf32> to vector<16x128xf32>
    %141 = arith.mulf %137, %140 : vector<16x128xf32>
    %142 = arith.addf %130, %141 : vector<16x128xf32>
    %cst_44 = arith.constant 1.000000e+01 : f32
    %143 = vector.broadcast %cst_44 : f32 to vector<16x128xf32>
    %144 = arith.subf %21, %143 : vector<16x128xf32>
    %145 = math.absf %144 : vector<16x128xf32>
    %cst_45 = arith.constant 1.000000e+00 : f32
    %146 = vector.broadcast %cst_45 : f32 to vector<16x128xf32>
    %147 = arith.subf %146, %145 : vector<16x128xf32>
    %cst_46 = arith.constant 0.000000e+00 : f32
    %148 = vector.broadcast %cst_46 : f32 to vector<16x128xf32>
    %149 = arith.maximumf %148, %147 : vector<16x128xf32>
    %c26 = arith.constant 26 : index
    %150 = arith.index_cast %5 : i32 to index
    %151 = vector.load %arg4[%c26, %150] : memref<32x128xf32, #tpu.memory_space<vmem>>, vector<1x128xf32>
    %152 = vector.broadcast %151 : vector<1x128xf32> to vector<16x128xf32>
    %153 = arith.mulf %149, %152 : vector<16x128xf32>
    %154 = arith.addf %142, %153 : vector<16x128xf32>
    %cst_47 = arith.constant 1.100000e+01 : f32
    %155 = vector.broadcast %cst_47 : f32 to vector<16x128xf32>
    %156 = arith.subf %21, %155 : vector<16x128xf32>
    %157 = math.absf %156 : vector<16x128xf32>
    %cst_48 = arith.constant 1.000000e+00 : f32
    %158 = vector.broadcast %cst_48 : f32 to vector<16x128xf32>
    %159 = arith.subf %158, %157 : vector<16x128xf32>
    %cst_49 = arith.constant 0.000000e+00 : f32
    %160 = vector.broadcast %cst_49 : f32 to vector<16x128xf32>
    %161 = arith.maximumf %160, %159 : vector<16x128xf32>
    %c27 = arith.constant 27 : index
    %162 = arith.index_cast %5 : i32 to index
    %163 = vector.load %arg4[%c27, %162] : memref<32x128xf32, #tpu.memory_space<vmem>>, vector<1x128xf32>
    %164 = vector.broadcast %163 : vector<1x128xf32> to vector<16x128xf32>
    %165 = arith.mulf %161, %164 : vector<16x128xf32>
    %166 = arith.addf %154, %165 : vector<16x128xf32>
    %cst_50 = arith.constant 1.200000e+01 : f32
    %167 = vector.broadcast %cst_50 : f32 to vector<16x128xf32>
    %168 = arith.subf %21, %167 : vector<16x128xf32>
    %169 = math.absf %168 : vector<16x128xf32>
    %cst_51 = arith.constant 1.000000e+00 : f32
    %170 = vector.broadcast %cst_51 : f32 to vector<16x128xf32>
    %171 = arith.subf %170, %169 : vector<16x128xf32>
    %cst_52 = arith.constant 0.000000e+00 : f32
    %172 = vector.broadcast %cst_52 : f32 to vector<16x128xf32>
    %173 = arith.maximumf %172, %171 : vector<16x128xf32>
    %c28 = arith.constant 28 : index
    %174 = arith.index_cast %5 : i32 to index
    %175 = vector.load %arg4[%c28, %174] : memref<32x128xf32, #tpu.memory_space<vmem>>, vector<1x128xf32>
    %176 = vector.broadcast %175 : vector<1x128xf32> to vector<16x128xf32>
    %177 = arith.mulf %173, %176 : vector<16x128xf32>
    %178 = arith.addf %166, %177 : vector<16x128xf32>
    %cst_53 = arith.constant 1.300000e+01 : f32
    %179 = vector.broadcast %cst_53 : f32 to vector<16x128xf32>
    %180 = arith.subf %21, %179 : vector<16x128xf32>
    %181 = math.absf %180 : vector<16x128xf32>
    %cst_54 = arith.constant 1.000000e+00 : f32
    %182 = vector.broadcast %cst_54 : f32 to vector<16x128xf32>
    %183 = arith.subf %182, %181 : vector<16x128xf32>
    %cst_55 = arith.constant 0.000000e+00 : f32
    %184 = vector.broadcast %cst_55 : f32 to vector<16x128xf32>
    %185 = arith.maximumf %184, %183 : vector<16x128xf32>
    %c29 = arith.constant 29 : index
    %186 = arith.index_cast %5 : i32 to index
    %187 = vector.load %arg4[%c29, %186] : memref<32x128xf32, #tpu.memory_space<vmem>>, vector<1x128xf32>
    %188 = vector.broadcast %187 : vector<1x128xf32> to vector<16x128xf32>
    %189 = arith.mulf %185, %188 : vector<16x128xf32>
    %190 = arith.addf %178, %189 : vector<16x128xf32>
    %cst_56 = arith.constant 1.400000e+01 : f32
    %191 = vector.broadcast %cst_56 : f32 to vector<16x128xf32>
    %192 = arith.subf %21, %191 : vector<16x128xf32>
    %193 = math.absf %192 : vector<16x128xf32>
    %cst_57 = arith.constant 1.000000e+00 : f32
    %194 = vector.broadcast %cst_57 : f32 to vector<16x128xf32>
    %195 = arith.subf %194, %193 : vector<16x128xf32>
    %cst_58 = arith.constant 0.000000e+00 : f32
    %196 = vector.broadcast %cst_58 : f32 to vector<16x128xf32>
    %197 = arith.maximumf %196, %195 : vector<16x128xf32>
    %c30 = arith.constant 30 : index
    %198 = arith.index_cast %5 : i32 to index
    %199 = vector.load %arg4[%c30, %198] : memref<32x128xf32, #tpu.memory_space<vmem>>, vector<1x128xf32>
    %200 = vector.broadcast %199 : vector<1x128xf32> to vector<16x128xf32>
    %201 = arith.mulf %197, %200 : vector<16x128xf32>
    %202 = arith.addf %190, %201 : vector<16x128xf32>
    %cst_59 = arith.constant 1.500000e+01 : f32
    %203 = vector.broadcast %cst_59 : f32 to vector<16x128xf32>
    %204 = arith.subf %21, %203 : vector<16x128xf32>
    %205 = math.absf %204 : vector<16x128xf32>
    %cst_60 = arith.constant 1.000000e+00 : f32
    %206 = vector.broadcast %cst_60 : f32 to vector<16x128xf32>
    %207 = arith.subf %206, %205 : vector<16x128xf32>
    %cst_61 = arith.constant 0.000000e+00 : f32
    %208 = vector.broadcast %cst_61 : f32 to vector<16x128xf32>
    %209 = arith.maximumf %208, %207 : vector<16x128xf32>
    %c31 = arith.constant 31 : index
    %210 = arith.index_cast %5 : i32 to index
    %211 = vector.load %arg4[%c31, %210] : memref<32x128xf32, #tpu.memory_space<vmem>>, vector<1x128xf32>
    %212 = vector.broadcast %211 : vector<1x128xf32> to vector<16x128xf32>
    %213 = arith.mulf %209, %212 : vector<16x128xf32>
    %214 = arith.addf %202, %213 : vector<16x128xf32>
    %c0_62 = arith.constant 0 : index
    %215 = arith.index_cast %5 : i32 to index
    %216 = vector.load %arg3[%c0_62, %215] : memref<16x128xf32, #tpu.memory_space<vmem>>, vector<16x128xf32>
    tpu.vector_store %arg3[%c0_62, %215], %214 {strides = array<i32>} : memref<16x128xf32, #tpu.memory_space<vmem>>, vector<16x128xf32>,
    %c1_i32 = arith.constant 1 : i32
    return
  }
  func.func @transform_0(%arg0: i32) -> (i32, i32) {
    %c0_i32 = arith.constant 0 : i32
    %c0_i32_0 = arith.constant 0 : i32
    return %arg0, %c0_i32 : i32, i32
  }
  func.func @transform_1(%arg0: i32) -> (i32, i32) {
    %c0_i32 = arith.constant 0 : i32
    %c0_i32_0 = arith.constant 0 : i32
    %c0_i32_1 = arith.constant 0 : i32
    return %c0_i32, %c0_i32_0 : i32, i32
  }
  func.func @transform_2(%arg0: i32) -> (i32, i32) {
    %c0_i32 = arith.constant 0 : i32
    %c0_i32_0 = arith.constant 0 : i32
    return %c0_i32, %arg0 : i32, i32
  }
}

</mosaic_0001>

<bundles_post_ra>
// kernel: tpu_custom_call.1
= control target key start
LH: loop header
LB: loop body
LE: loop exit
PB: predicated region body
PF: predicated region fallthrough
CT: control target
= control target key end

     0   :  { %vm32_vm0 = vcmask 195584   ;;  %s854_s0 = inlined_call_operand.vmem [shape: f32[128,24], index: 0, kind: input, shape index: {}]   ;;  %s855_s1 = inlined_call_operand.vmem [shape: f32[32,24], index: 1, kind: input, shape index: {}]   ;;  %s856_s2 = inlined_call_operand.hbm [shape: f32[16,128], index: 2, kind: output, shape index: {}]  }
   0x1   :  { %v31_v0 = vld [vmem:[%s854_s0 + $0x78] sm:$0xff]  ;;  %v30_v1 = vld [vmem:[%s854_s0 + $0x70] sm:$0xff]  ;;  %v29_v2 = vld [vmem:[%s854_s0 + $0x68] sm:$0xff] }
   0x2   :  { %574 = vmatprep.subr.msk.mxu0 %vm32_vm0, %v31_v0  ;;  %612 = vmatprep.subr.msk.mxu1 %vm32_vm0, %v31_v0  ;;  %v12_v3 = vld [vmem:[%s855_s1] sm:$0xff]  ;;  %v14_v4 = vld [vmem:[%s855_s1 + $0x10] sm:$0xff] }
   0x3   :  { %575 = vmatpush3.xpose.msk.msra.mxu0 %vm32_vm0, %v31_v0  ;;  %628 = vmatpush3.xpose.msk.msra.mxu1 %vm32_vm0, %v31_v0 }
   0x4   :  { %576 = vmatprep.subr.msk.mxu0 %vm32_vm0, %v30_v1  ;;  %613 = vmatprep.subr.msk.mxu1 %vm32_vm0, %v30_v1 }
   0x7   :  { %577 = vmatpush3.xpose.msk.msra.mxu0 %vm32_vm0, %v30_v1  ;;  %629 = vmatpush3.xpose.msk.msra.mxu1 %vm32_vm0, %v30_v1 }
   0x8   :  { %7 = vsyncpa [#allocation4], 0  ;;  %578 = vmatprep.subr.msk.mxu0 %vm32_vm0, %v29_v2  ;;  %614 = vmatprep.subr.msk.mxu1 %vm32_vm0, %v29_v2  ;;  %v28_v5 = vld [vmem:[%s854_s0 + $0x60] sm:$0xff]  ;;  %v27_v6 = vld [vmem:[%s854_s0 + $0x58] sm:$0xff] }
   0x9   :  { %606 = vmatprep.mubr.msk.f32.mxu0 %vm32_vm0, %v12_v3  ;;  %609 = vmatprep.mubr.msk.f32.mxu1 %vm32_vm0, %v14_v4  ;;  %v26_v7 = vld [vmem:[%s854_s0 + $0x50] sm:$0xff]  ;;  %v25_v8 = vld [vmem:[%s854_s0 + $0x48] sm:$0xff]  ;;  %v24_v9 = vld [vmem:[%s854_s0 + $0x40] sm:$0xff] }
   0xa   :  { %v23_v10 = vld [vmem:[%s854_s0 + $0x38] sm:$0xff]  ;;  %v22_v11 = vld [vmem:[%s854_s0 + $0x30] sm:$0xff]  ;;  %v21_v12 = vld [vmem:[%s854_s0 + $0x28] sm:$0xff] }
   0xb   :  { %579 = vmatpush3.xpose.msk.msra.mxu0 %vm32_vm0, %v29_v2  ;;  %630 = vmatpush3.xpose.msk.msra.mxu1 %vm32_vm0, %v29_v2  ;;  %v20_v13 = vld [vmem:[%s854_s0 + $0x20] sm:$0xff]  ;;  %v19_v14 = vld [vmem:[%s854_s0 + $0x18] sm:$0xff]  ;;  %v18_v15 = vld [vmem:[%s854_s0 + $0x10] sm:$0xff] }
   0xc   :  { %580 = vmatprep.subr.msk.mxu0 %vm32_vm0, %v28_v5  ;;  %615 = vmatprep.subr.msk.mxu1 %vm32_vm0, %v28_v5  ;;  %v17_v16 = vld [vmem:[%s854_s0 + $0x8] sm:$0xff]  ;;  %v16_v17 = vld [vmem:[%s854_s0] sm:$0xff]  ;;  %v15_v19 = vld [vmem:[%s855_s1 + $0x18] sm:$0xff]  ;;  %s669_s0 = smov [#allocation3]  }
   0xd   :  { %v13_v18 = vld [vmem:[%s855_s1 + $0x8] sm:$0xff]  ;;  %s475_s1 = sshll.u32 %s669_s0, 4  ;;  %s476_s1 = int_to_ptr.vmem [resolvable:$true] %s475_s1 }
   0xe   :  { %s647_s21 = scalar_lea.vmem %s476_s1, 256  ;;  %p652_p1 = scmp.lt.s32.totalorder %s476_s1, %s476_s1 }
   0xf   :  { %581 = vmatpush3.xpose.msk.msra.mxu0 %vm32_vm0, %v28_v5  ;;  %631 = vmatpush3.xpose.msk.msra.mxu1 %vm32_vm0, %v28_v5  ;;  %p648_p0 = scmp.ne.s32.totalorder %s476_s1, %s647_s21  ;;  %p653_p2 = scmp.lt.s32.totalorder %s647_s21, %s647_s21 }
  0x10   :  { %582 = vmatprep.subr.msk.mxu0 %vm32_vm0, %v27_v6  ;;  %616 = vmatprep.subr.msk.mxu1 %vm32_vm0, %v27_v6 }
  0x11   :  { %p654_p3 = por %p653_p2, %p652_p1 }
  0x13   :  { %583 = vmatpush3.xpose.msk.msra.mxu0 %vm32_vm0, %v27_v6  ;;  %632 = vmatpush3.xpose.msk.msra.mxu1 %vm32_vm0, %v27_v6  ;;  %p655_p4 = pnand %p654_p3, %p648_p0 }
  0x14   :  { %584 = vmatprep.subr.msk.mxu0 %vm32_vm0, %v26_v7  ;;  %617 = vmatprep.subr.msk.mxu1 %vm32_vm0, %v26_v7 }
  0x17   :  { %585 = vmatpush3.xpose.msk.msra.mxu0 %vm32_vm0, %v26_v7  ;;  %633 = vmatpush3.xpose.msk.msra.mxu1 %vm32_vm0, %v26_v7 }
  0x18   :  { %586 = vmatprep.subr.msk.mxu0 %vm32_vm0, %v25_v8  ;;  %618 = vmatprep.subr.msk.mxu1 %vm32_vm0, %v25_v8 }
  0x1b   :  { %587 = vmatpush3.xpose.msk.msra.mxu0 %vm32_vm0, %v25_v8  ;;  %634 = vmatpush3.xpose.msk.msra.mxu1 %vm32_vm0, %v25_v8 }
  0x1c   :  { %588 = vmatprep.subr.msk.mxu0 %vm32_vm0, %v24_v9  ;;  %619 = vmatprep.subr.msk.mxu1 %vm32_vm0, %v24_v9 }
  0x1f   :  { %589 = vmatpush3.xpose.msk.msra.mxu0 %vm32_vm0, %v24_v9  ;;  %635 = vmatpush3.xpose.msk.msra.mxu1 %vm32_vm0, %v24_v9 }
  0x20   :  { %590 = vmatprep.subr.msk.mxu0 %vm32_vm0, %v23_v10  ;;  %620 = vmatprep.subr.msk.mxu1 %vm32_vm0, %v23_v10 }
  0x23   :  { %591 = vmatpush3.xpose.msk.msra.mxu0 %vm32_vm0, %v23_v10  ;;  %636 = vmatpush3.xpose.msk.msra.mxu1 %vm32_vm0, %v23_v10 }
  0x24   :  { %592 = vmatprep.subr.msk.mxu0 %vm32_vm0, %v22_v11  ;;  %621 = vmatprep.subr.msk.mxu1 %vm32_vm0, %v22_v11 }
  0x27   :  { %593 = vmatpush3.xpose.msk.msra.mxu0 %vm32_vm0, %v22_v11  ;;  %637 = vmatpush3.xpose.msk.msra.mxu1 %vm32_vm0, %v22_v11 }
  0x28   :  { %594 = vmatprep.subr.msk.mxu0 %vm32_vm0, %v21_v12  ;;  %622 = vmatprep.subr.msk.mxu1 %vm32_vm0, %v21_v12 }
  0x2b   :  { %595 = vmatpush3.xpose.msk.msra.mxu0 %vm32_vm0, %v21_v12  ;;  %638 = vmatpush3.xpose.msk.msra.mxu1 %vm32_vm0, %v21_v12 }
  0x2c   :  { %596 = vmatprep.subr.msk.mxu0 %vm32_vm0, %v20_v13  ;;  %623 = vmatprep.subr.msk.mxu1 %vm32_vm0, %v20_v13 }
  0x2f   :  { %597 = vmatpush3.xpose.msk.msra.mxu0 %vm32_vm0, %v20_v13  ;;  %639 = vmatpush3.xpose.msk.msra.mxu1 %vm32_vm0, %v20_v13 }
  0x30   :  { %598 = vmatprep.subr.msk.mxu0 %vm32_vm0, %v19_v14  ;;  %624 = vmatprep.subr.msk.mxu1 %vm32_vm0, %v19_v14 }
  0x33   :  { %599 = vmatpush3.xpose.msk.msra.mxu0 %vm32_vm0, %v19_v14  ;;  %640 = vmatpush3.xpose.msk.msra.mxu1 %vm32_vm0, %v19_v14 }
  0x34   :  { %600 = vmatprep.subr.msk.mxu0 %vm32_vm0, %v18_v15  ;;  %625 = vmatprep.subr.msk.mxu1 %vm32_vm0, %v18_v15 }
  0x37   :  { %601 = vmatpush3.xpose.msk.msra.mxu0 %vm32_vm0, %v18_v15  ;;  %641 = vmatpush3.xpose.msk.msra.mxu1 %vm32_vm0, %v18_v15 }
  0x38   :  { %602 = vmatprep.subr.msk.mxu0 %vm32_vm0, %v17_v16  ;;  %626 = vmatprep.subr.msk.mxu1 %vm32_vm0, %v17_v16 }
  0x3b   :  { %603 = vmatpush3.xpose.msk.msra.mxu0 %vm32_vm0, %v17_v16  ;;  %642 = vmatpush3.xpose.msk.msra.mxu1 %vm32_vm0, %v17_v16 }
  0x3c   :  { %604 = vmatprep.subr.msk.mxu0 %vm32_vm0, %v16_v17  ;;  %627 = vmatprep.subr.msk.mxu1 %vm32_vm0, %v16_v17 }
  0x3f   :  { %605 = vmatpush3.xpose.msk.msra.mxu0 %vm32_vm0, %v16_v17  ;;  %643 = vmatpush3.xpose.msk.msra.mxu1 %vm32_vm0, %v16_v17 }
  0x42   :  { %607 = vmatmul.mubr.msk.f32.vlgmr.msra.gmra.mxu0 %vm32_vm0, %v13_v18  ;;  %610 = vmatmul.mubr.msk.f32.vlgmr.msra.gmra.mxu1 %vm32_vm0, %v15_v19 }
 0x102   :  { %v608_v20 = vpop.f32.mrf.mxu0  ;;  %v611_v21 = vpop.f32.mrf.mxu1 }
 0x103   :  { %v185_v22 = vmul.f32 2.0, %v608_v20  ;;  %181 = vst [vmem:[#allocation2 + $0x18] sm:$0xff] %v611_v21 }
 0x104   :  { %v159_v23 = vpop.f32.mrf.mxu0  ;;  %v169_v24 = vpop.f32.mrf.mxu1 }
 0x105   :  { %v507_v25 = vadd.f32 -1.0, %v185_v22  ;;  %v184_v26 = vmul.f32 2.0, %v159_v23  ;;  %180 = vst [vmem:[#allocation2 + $0x10] sm:$0xff] %v169_v24 }
 0x107   :  { %v189_v27 = vmul.f32 0.999, %v507_v25  ;;  %v506_v28 = vadd.f32 -1.0, %v184_v26 }
 0x109   :  { %v191_v29 = vadd.f32 1.0, %v189_v27  ;;  %v188_v30 = vmul.f32 0.999, %v506_v28 }
 0x10b   :  { %v193_v31 = vmul.f32 7.5, %v191_v29  ;;  %v190_v32 = vadd.f32 1.0, %v188_v30 }
 0x10c   :  { %v508_v41 = vld [vmem:[#allocation2 + $0x10] ss:$0 sm:$0xff]  ;;  %v511_v50 = vld [vmem:[#allocation2 + $0x11] ss:$0 sm:$0xff]  ;;  %v514_v59 = vld [vmem:[#allocation2 + $0x12] ss:$0 sm:$0xff] }
 0x10d   :  { %v195_v33 = vmax.f32 %v193_v31, 0.0  ;;  %v192_v34 = vmul.f32 7.5, %v190_v32  ;;  %v517_v4 = vld [vmem:[#allocation2 + $0x13] ss:$0 sm:$0xff]  ;;  %v520_v29 = vld [vmem:[#allocation2 + $0x14] ss:$0 sm:$0xff] }
 0x10f   :  { %v815_v35 = vmin.f32 %v195_v33, 15.0  ;;  %v194_v36 = vmax.f32 %v192_v34, 0.0 }
 0x111   :  { %v817_v37 = vmin.f32 %v194_v36, 15.0  ;;  %v199_v38 = vand.u32 2147483647, %v815_v35  ;;  %v510_v39 = vadd.f32 -1.0, %v815_v35  ;;  %v513_v40 = vadd.f32 -2.0, %v815_v35 }
 0x112   :  { %v516_v42 = vadd.f32 -3.0, %v815_v35  ;;  %v519_v43 = vadd.f32 -4.0, %v815_v35  ;;  %v522_v44 = vadd.f32 -5.0, %v815_v35  ;;  %v525_v45 = vadd.f32 -6.0, %v815_v35 }
 0x113   :  { %v198_v46 = vand.u32 2147483647, %v817_v37  ;;  %v201_v47 = vsub.f32 1.0, %v199_v38  ;;  %v509_v48 = vadd.f32 -1.0, %v817_v37  ;;  %v216_v49 = vand.u32 2147483647, %v510_v39 }
 0x114   :  { %v512_v51 = vadd.f32 -2.0, %v817_v37  ;;  %v233_v52 = vand.u32 2147483647, %v513_v40  ;;  %v515_v53 = vadd.f32 -3.0, %v817_v37  ;;  %v250_v54 = vand.u32 2147483647, %v516_v42 }
 0x115   :  { %v200_v55 = vsub.f32 1.0, %v198_v46  ;;  %v203_v56 = vmax.f32 %v201_v47, 0.0  ;;  %v215_v57 = vand.u32 2147483647, %v509_v48  ;;  %v218_v58 = vsub.f32 1.0, %v216_v49 }
 0x116   :  { %v232_v60 = vand.u32 2147483647, %v512_v51  ;;  %v235_v61 = vsub.f32 1.0, %v233_v52  ;;  %v249_v62 = vand.u32 2147483647, %v515_v53  ;;  %v252_v63 = vsub.f32 1.0, %v250_v54 }
 0x117   :  { %v202_v0 = vmax.f32 %v200_v55, 0.0  ;;  %v210_v1 = vmul.f32 %v508_v41, %v203_v56  ;;  %v217_v2 = vsub.f32 1.0, %v215_v57  ;;  %v220_v3 = vmax.f32 %v218_v58, 0.0  ;;  %v523_v39 = vld [vmem:[#allocation2 + $0x15] ss:$0 sm:$0xff] }
 0x118   :  { %v234_v5 = vsub.f32 1.0, %v232_v60  ;;  %v237_v6 = vmax.f32 %v235_v61, 0.0  ;;  %v251_v7 = vsub.f32 1.0, %v249_v62  ;;  %v254_v8 = vmax.f32 %v252_v63, 0.0  ;;  %v526_v49 = vld [vmem:[#allocation2 + $0x16] ss:$0 sm:$0xff] }
 0x119   :  { %v209_v9 = vmul.f32 %v508_v41, %v202_v0  ;;  %v219_v10 = vmax.f32 %v217_v2, 0.0  ;;  %v227_v11 = vmul.f32 %v511_v50, %v220_v3  ;;  %v518_v12 = vadd.f32 -4.0, %v817_v37 }
 0x11a   :  { %v236_v13 = vmax.f32 %v234_v5, 0.0  ;;  %v244_v14 = vmul.f32 %v514_v59, %v237_v6  ;;  %v253_v15 = vmax.f32 %v251_v7, 0.0  ;;  %v261_v16 = vmul.f32 %v517_v4, %v254_v8 }
 0x11b   :  { %v226_v17 = vmul.f32 %v511_v50, %v219_v10  ;;  %v229_v18 = vadd.f32 %v227_v11, %v210_v1  ;;  %v266_v19 = vand.u32 2147483647, %v518_v12  ;;  %v267_v20 = vand.u32 2147483647, %v519_v43  ;;  %v529_v11 = vld [vmem:[#allocation2 + $0x17] ss:$0 sm:$0xff] }
 0x11c   :  { %v243_v21 = vmul.f32 %v514_v59, %v236_v13  ;;  %v260_v22 = vmul.f32 %v517_v4, %v253_v15  ;;  %v521_v23 = vadd.f32 -5.0, %v817_v37  ;;  %v284_v24 = vand.u32 2147483647, %v522_v44 }
 0x11d   :  { %v228_v25 = vadd.f32 %v226_v17, %v209_v9  ;;  %v246_v26 = vadd.f32 %v244_v14, %v229_v18  ;;  %v268_v27 = vsub.f32 1.0, %v266_v19  ;;  %v269_v28 = vsub.f32 1.0, %v267_v20  ;;  %v532_v18 = vld [vmem:[#allocation2 + $0x18] ss:$0 sm:$0xff] }
 0x11e   :  { %v283_v30 = vand.u32 2147483647, %v521_v23  ;;  %v286_v31 = vsub.f32 1.0, %v284_v24  ;;  %v524_v32 = vadd.f32 -6.0, %v817_v37  ;;  %v301_v33 = vand.u32 2147483647, %v525_v45 }
 0x11f   :  { %v245_v34 = vadd.f32 %v243_v21, %v228_v25  ;;  %v270_v36 = vmax.f32 %v268_v27, 0.0  ;;  %v271_v38 = vmax.f32 %v269_v28, 0.0  ;;  %v263_v40 = vadd.f32 %v261_v16, %v246_v26 }
 0x120   :  { %v285_v41 = vsub.f32 1.0, %v283_v30  ;;  %v288_v42 = vmax.f32 %v286_v31, 0.0  ;;  %v300_v43 = vand.u32 2147483647, %v524_v32  ;;  %v303_v46 = vsub.f32 1.0, %v301_v33 }
 0x121   :  { %v277_v44 = vmul.f32 %v520_v29, %v270_v36  ;;  %v278_v47 = vmul.f32 %v520_v29, %v271_v38  ;;  %v262_v48 = vadd.f32 %v260_v22, %v245_v34  ;;  %v527_v50 = vadd.f32 -7.0, %v817_v37  ;;  %v535_v34 = vld [vmem:[#allocation2 + $0x19] ss:$0 sm:$0xff] }
 0x122   :  { %v287_v51 = vmax.f32 %v285_v41, 0.0  ;;  %v295_v52 = vmul.f32 %v523_v39, %v288_v42  ;;  %v302_v53 = vsub.f32 1.0, %v300_v43  ;;  %v305_v54 = vmax.f32 %v303_v46, 0.0 }
 0x123   :  { %v279_v45 = vadd.f32 %v277_v44, %v262_v48  ;;  %v280_v55 = vadd.f32 %v278_v47, %v263_v40  ;;  %v528_v56 = vadd.f32 -7.0, %v815_v35  ;;  %v317_v57 = vand.u32 2147483647, %v527_v50  ;;  %v538_v44 = vld [vmem:[#allocation2 + $0x1a] ss:$0 sm:$0xff] }
 0x124   :  { %v294_v58 = vmul.f32 %v523_v39, %v287_v51  ;;  %v304_v59 = vmax.f32 %v302_v53, 0.0  ;;  %v312_v60 = vmul.f32 %v526_v49, %v305_v54  ;;  %v530_v61 = vadd.f32 -8.0, %v817_v37 }
 0x125   :  { %v297_v62 = vadd.f32 %v295_v52, %v280_v55  ;;  %v318_v63 = vand.u32 2147483647, %v528_v56  ;;  %v319_v0 = vsub.f32 1.0, %v317_v57  ;;  %v531_v1 = vadd.f32 -8.0, %v815_v35 }
 0x126   :  { %v296_v2 = vadd.f32 %v294_v58, %v279_v45  ;;  %v311_v3 = vmul.f32 %v526_v49, %v304_v59  ;;  %v334_v4 = vand.u32 2147483647, %v530_v61  ;;  %v533_v5 = vadd.f32 -9.0, %v817_v37 }
 0x127   :  { %v314_v6 = vadd.f32 %v312_v60, %v297_v62  ;;  %v320_v7 = vsub.f32 1.0, %v318_v63  ;;  %v321_v8 = vmax.f32 %v319_v0, 0.0  ;;  %v335_v9 = vand.u32 2147483647, %v531_v1  ;;  %v541_v1 = vld [vmem:[#allocation2 + $0x1b] ss:$0 sm:$0xff] }
 0x128   :  { %v313_v10 = vadd.f32 %v311_v3, %v296_v2  ;;  %v336_v12 = vsub.f32 1.0, %v334_v4  ;;  %v534_v13 = vadd.f32 -9.0, %v815_v35  ;;  %v351_v14 = vand.u32 2147483647, %v533_v5 }
 0x129   :  { %v322_v15 = vmax.f32 %v320_v7, 0.0  ;;  %v328_v16 = vmul.f32 %v529_v11, %v321_v8  ;;  %v337_v17 = vsub.f32 1.0, %v335_v9  ;;  %v536_v19 = vadd.f32 -10.0, %v817_v37  ;;  %v544_v8 = vld [vmem:[#allocation2 + $0x1c] ss:$0 sm:$0xff] }
 0x12a   :  { %v338_v20 = vmax.f32 %v336_v12, 0.0  ;;  %v352_v21 = vand.u32 2147483647, %v534_v13  ;;  %v353_v22 = vsub.f32 1.0, %v351_v14  ;;  %v537_v23 = vadd.f32 -10.0, %v815_v35 }
 0x12b   :  { %v329_v24 = vmul.f32 %v529_v11, %v322_v15  ;;  %v330_v25 = vadd.f32 %v328_v16, %v313_v10  ;;  %v339_v26 = vmax.f32 %v337_v17, 0.0  ;;  %v368_v27 = vand.u32 2147483647, %v536_v19 }
 0x12c   :  { %v345_v28 = vmul.f32 %v532_v18, %v338_v20  ;;  %v354_v29 = vsub.f32 1.0, %v352_v21  ;;  %v355_v30 = vmax.f32 %v353_v22, 0.0  ;;  %v369_v31 = vand.u32 2147483647, %v537_v23 }
 0x12d   :  { %v331_v32 = vadd.f32 %v329_v24, %v314_v6  ;;  %v346_v33 = vmul.f32 %v532_v18, %v339_v26  ;;  %v370_v36 = vsub.f32 1.0, %v368_v27  ;;  %v539_v38 = vadd.f32 -11.0, %v817_v37  ;;  %v547_v24 = vld [vmem:[#allocation2 + $0x1d] ss:$0 sm:$0xff] }
 0x12e   :  { %v347_v39 = vadd.f32 %v345_v28, %v330_v25  ;;  %v356_v40 = vmax.f32 %v354_v29, 0.0  ;;  %v362_v41 = vmul.f32 %v535_v34, %v355_v30  ;;  %v371_v42 = vsub.f32 1.0, %v369_v31 }
 0x12f   :  { %v348_v43 = vadd.f32 %v346_v33, %v331_v32  ;;  %v372_v46 = vmax.f32 %v370_v36, 0.0  ;;  %v540_v47 = vadd.f32 -11.0, %v815_v35  ;;  %v385_v48 = vand.u32 2147483647, %v539_v38 }
 0x130   :  { %v363_v49 = vmul.f32 %v535_v34, %v356_v40  ;;  %v364_v50 = vadd.f32 %v362_v41, %v347_v39  ;;  %v373_v51 = vmax.f32 %v371_v42, 0.0  ;;  %v542_v52 = vadd.f32 -12.0, %v817_v37  ;;  %v550_v40 = vld [vmem:[#allocation2 + $0x1e] ss:$0 sm:$0xff] }
 0x131   :  { %v379_v53 = vmul.f32 %v538_v44, %v372_v46  ;;  %v386_v54 = vand.u32 2147483647, %v540_v47  ;;  %v387_v45 = vsub.f32 1.0, %v385_v48  ;;  %v543_v55 = vadd.f32 -12.0, %v815_v35 }
 0x132   :  { %v365_v56 = vadd.f32 %v363_v49, %v348_v43  ;;  %v380_v57 = vmul.f32 %v538_v44, %v373_v51  ;;  %v402_v58 = vand.u32 2147483647, %v542_v52  ;;  %v545_v59 = vadd.f32 -13.0, %v817_v37  ;;  %v553_v49 = vld [vmem:[#allocation2 + $0x1f] ss:$0 sm:$0xff] }
 0x133   :  { %v381_v60 = vadd.f32 %v379_v53, %v364_v50  ;;  %v388_v61 = vsub.f32 1.0, %v386_v54  ;;  %v389_v62 = vmax.f32 %v387_v45, 0.0  ;;  %v403_v63 = vand.u32 2147483647, %v543_v55 }
 0x134   :  { %v382_v0 = vadd.f32 %v380_v57, %v365_v56  ;;  %v404_v2 = vsub.f32 1.0, %v402_v58  ;;  %v546_v3 = vadd.f32 -13.0, %v815_v35  ;;  %v419_v4 = vand.u32 2147483647, %v545_v59 }
 0x135   :  { %v390_v5 = vmax.f32 %v388_v61, 0.0  ;;  %v396_v6 = vmul.f32 %v541_v1, %v389_v62  ;;  %v405_v7 = vsub.f32 1.0, %v403_v63  ;;  %v548_v9 = vadd.f32 -14.0, %v817_v37 }
 0x136   :  { %v406_v10 = vmax.f32 %v404_v2, 0.0  ;;  %v420_v11 = vand.u32 2147483647, %v546_v3  ;;  %v421_v12 = vsub.f32 1.0, %v419_v4  ;;  %v549_v13 = vadd.f32 -14.0, %v815_v35 }
 0x137   :  { %v397_v14 = vmul.f32 %v541_v1, %v390_v5  ;;  %v398_v15 = vadd.f32 %v396_v6, %v381_v60  ;;  %v407_v16 = vmax.f32 %v405_v7, 0.0  ;;  %v436_v17 = vand.u32 2147483647, %v548_v9 }
 0x138   :  { %v413_v18 = vmul.f32 %v544_v8, %v406_v10  ;;  %v422_v19 = vsub.f32 1.0, %v420_v11  ;;  %v423_v20 = vmax.f32 %v421_v12, 0.0  ;;  %v437_v21 = vand.u32 2147483647, %v549_v13 }
 0x139   :  { %v399_v22 = vadd.f32 %v397_v14, %v382_v0  ;;  %v414_v23 = vmul.f32 %v544_v8, %v407_v16  ;;  %v438_v25 = vsub.f32 1.0, %v436_v17  ;;  %v551_v26 = vadd.f32 -15.0, %v817_v37 }
 0x13a   :  { %v415_v27 = vadd.f32 %v413_v18, %v398_v15  ;;  %v424_v28 = vmax.f32 %v422_v19, 0.0  ;;  %v430_v29 = vmul.f32 %v547_v24, %v423_v20  ;;  %v439_v30 = vsub.f32 1.0, %v437_v21 }
 0x13b   :  { %v416_v31 = vadd.f32 %v414_v23, %v399_v22  ;;  %v440_v32 = vmax.f32 %v438_v25, 0.0  ;;  %v552_v33 = vadd.f32 -15.0, %v815_v35  ;;  %v453_v34 = vand.u32 2147483647, %v551_v26 }
 0x13c   :  { %v431_v36 = vmul.f32 %v547_v24, %v424_v28  ;;  %v432_v38 = vadd.f32 %v430_v29, %v415_v27  ;;  %v441_v39 = vmax.f32 %v439_v30, 0.0 }
 0x13d   :  { %v447_v41 = vmul.f32 %v550_v40, %v440_v32  ;;  %v454_v42 = vand.u32 2147483647, %v552_v33  ;;  %v455_v43 = vsub.f32 1.0, %v453_v34 }
 0x13e   :  { %v433_v46 = vadd.f32 %v431_v36, %v416_v31  ;;  %v448_v44 = vmul.f32 %v550_v40, %v441_v39 }
 0x13f   :  { %v449_v47 = vadd.f32 %v447_v41, %v432_v38  ;;  %v456_v37 = vsub.f32 1.0, %v454_v42  ;;  %v457_v48 = vmax.f32 %v455_v43, 0.0 }
 0x140   :  { %v450_v50 = vadd.f32 %v448_v44, %v433_v46 }
 0x141   :  { %v458_v51 = vmax.f32 %v456_v37, 0.0  ;;  %v464_v52 = vmul.f32 %v553_v49, %v457_v48 }
 0x143   :  { %v465_v35 = vmul.f32 %v553_v49, %v458_v51  ;;  %v466_v53 = vadd.f32 %v464_v52, %v449_v47 }
 0x145   :  { %v467_v54 = vadd.f32 %v465_v35, %v450_v50  ;;  %468 = vst [vmem:[#allocation3] sm:$0xff] %v466_v53 }
 0x147   :  { %469 = vst [vmem:[#allocation3 + $0x8] sm:$0xff] %v467_v54 }
 0x148   :  { %658 = shalt.err (!%p655_p4)
}
 0x149   :  { %s670_s22 = smov 128   ;;  %s671_s23 = smov 8  }
 0x14a   :  { %481 = dma.vmem_to_hbm [thread:$0]  %s476_s1, 256, %s856_s2, [#allocation4], %s670_s22, %s670_s22, %s671_s23  }
 0x14b   :  { %667 = dma.done.wait [#allocation4], 256  }
 0x14c   :  { %668 = vsyncadd [#allocation4], 4294967040 }
 0x14d   :  { %485 = vsyncpa [#allocation4], 1 }

</bundles_post_ra>
